<compile_context>
chip_gen: v5e
topology: v5e:2x2
jax: 0.10.0
libtpu: 0.0.40
codegen_flags: <defaults>
</compile_context>

<pallas_src>
import math

import jax
import jax.numpy as jnp
from jax.experimental import pallas as pl
from jax.experimental.pallas import tpu as pltpu

LANES = 128
SUBLANES = 8
# Cap for the resident f32 pos_weight tile: 4096 rows * 128 lanes * 4 B = 2 MiB.
_MAX_RESIDENT_PW_ROWS = 4096


def _make_focal_kernel(tile_rows: int, num_tiles: int, valid_in_last: int, gamma: float):
    """Build a per-tile kernel emitting 128 lane-wise partial sums of the focal loss."""
    tile_elems = tile_rows * LANES
    needs_mask = valid_in_last != tile_elems  # compile-time: any padded / OOB elements?
    gamma = float(gamma)

    def kernel(x_ref, y_ref, pw_ref, out_ref):
        x = x_ref[...].astype(jnp.float32)
        y = y_ref[...].astype(jnp.float32)
        pw = pw_ref[...]  # float32 pos_weight rows (resident across the grid, or streamed)

        # Numerically-stable shared pieces; one exp + one log1p per element:
        #   e      = exp(-|x|)
        #   sp_neg = softplus(-x) = max(-x, 0) + log1p(e)
        #   sp_pos = softplus(x)  = sp_neg + x
        #   p      = sigmoid(x)   = where(x >= 0, 1, e) / (1 + e)
        e = jnp.exp(-jnp.abs(x))
        sp_neg = jnp.maximum(-x, 0.0) + jnp.log1p(e)
        sp_pos = sp_neg + x
        # Exact reciprocal keeps us comfortably inside the 1e-4 reference tolerance;
        # pl.reciprocal(1+e, approx=True) is a further EUP micro-opt if the budget allows.
        p = jnp.where(x >= 0.0, 1.0, e) / (1.0 + e)

        # binary_cross_entropy_with_logits(reduction='none', pos_weight=pw)
        ce = pw * y * sp_neg + (1.0 - y) * sp_pos

        # Focal modulation.
        p_t = p * y + (1.0 - p) * (1.0 - y)
        q = 1.0 - p_t
        if gamma == 2.0:
            focal = q * q
        else:
            focal = q ** gamma  # TODO(synk): non-2 gamma lowers via exp/log on the EUP.
        loss = ce * focal

        if needs_mask:
            # Only the last grid step carries padded / out-of-bounds elements; every other
            # tile skips the iota + compare + select entirely.
            is_last = pl.program_id(0) == num_tiles - 1

            @pl.when(is_last)
            def _():
                flat_idx = (
                    jax.lax.broadcasted_iota(jnp.int32, (tile_rows, LANES), 0) * LANES
                    + jax.lax.broadcasted_iota(jnp.int32, (tile_rows, LANES), 1)
                )
                masked = jnp.where(flat_idx < valid_in_last, loss, 0.0)
                out_ref[...] = jnp.sum(masked, axis=0, keepdims=True)

            @pl.when(pl.program_id(0) < num_tiles - 1)
            def _():
                out_ref[...] = jnp.sum(loss, axis=0, keepdims=True)
        else:
            out_ref[...] = jnp.sum(loss, axis=0, keepdims=True)

    return kernel


def focal_loss(inputs, targets, pos_weight=None, *, gamma=2.0, reduction="mean",
               tile_rows=2048):
    """Pallas implementation of FocalLoss(gamma, reduction, pos_weight) forward pass."""
    if reduction not in ("mean", "sum"):
        # TODO(synk): reduction='none' (per-element output) not implemented in this kernel.
        raise NotImplementedError("only reduction='mean' or 'sum' supported")

    B, C = inputs.shape
    total = B * C
    assert total < 2 ** 31, "flat index math assumes < 2^31 elements"

    if pos_weight is None:
        pos_weight = jnp.ones((C,), jnp.float32)
    pos_weight = pos_weight.astype(jnp.float32)

    # --- Lane-dense flat view: B*C elements as rows of 128 lanes. -------------------------
    # A reshape of a contiguous row-major array is a free relabel; a copy is only paid when
    # total % 128 != 0, and then we pad fewer than 128 trailing elements (masked in-kernel).
    pad = (-total) % LANES
    flat_x = inputs.reshape(-1)
    flat_y = targets.reshape(-1)
    if pad:
        flat_x = jnp.pad(flat_x, (0, pad))
        flat_y = jnp.pad(flat_y, (0, pad))
    rows = (total + pad) // LANES
    x2 = flat_x.reshape(rows, LANES)
    y2 = flat_y.reshape(rows, LANES)

    # --- Tile-size selection. --------------------------------------------------------------
    # Per flat element the weight is pos_weight[idx % C]; in the (rows, 128) view the pattern
    # repeats every `period` rows.  A tile whose row count is a multiple of lcm(8, period)
    # starts every grid step at phase 0, so a single (tr, 128) pos_weight tile stays resident
    # in VMEM for the whole grid.  The lcm is capped against a VMEM budget (unfriendly C).
    period = C // math.gcd(C, LANES)
    base = (SUBLANES * period) // math.gcd(SUBLANES, period)  # lcm(8, period)
    resident_pw = base <= _MAX_RESIDENT_PW_ROWS
    unit = base if resident_pw else SUBLANES

    if rows <= unit:
        tr = rows                                   # single full-array block
    else:
        tr = max(unit, (tile_rows // unit) * unit)  # requested tile, unit-aligned
        if tr >= rows:
            # Keep >= 2 tiles so dimension_semantics=("parallel",) shards across both
            # TensorCores on v7x instead of collapsing to one tile.
            tr = max(unit, pl.cdiv(pl.cdiv(rows, 2), unit) * unit)
    num_tiles = pl.cdiv(rows, tr)
    valid_in_last = total - (num_tiles - 1) * tr * LANES

    # --- pos_weight rows. --------------------------------------------------------------------
    def pw_rows(n_rows):
        reps = pl.cdiv(n_rows * LANES, C)
        return jnp.tile(pos_weight, reps)[: n_rows * LANES].reshape(n_rows, LANES)

    if resident_pw:
        pw_arr = pw_rows(tr)                                   # one resident, phase-aligned tile
        pw_spec = pl.BlockSpec((tr, LANES), lambda i: (0, 0))
    else:
        # TODO(synk): pathological C (huge lcm with 128): stream full-size pos_weight rows
        # instead of holding an lcm-sized tile resident (extra HBM traffic, but bounded VMEM).
        pw_arr = pw_rows(rows)
        pw_spec = pl.BlockSpec((tr, LANES), lambda i: (i, 0))

    kernel = _make_focal_kernel(tr, num_tiles, valid_in_last, float(gamma))

    bytes_accessed = int(
        x2.size * x2.dtype.itemsize
        + y2.size * y2.dtype.itemsize
        + pw_arr.size * 4
        + num_tiles * LANES * 4
    )
    cost = pl.CostEstimate(
        flops=int(15 * total),
        transcendentals=int(3 * total),
        bytes_accessed=bytes_accessed,
    )

    partials = pl.pallas_call(
        kernel,
        out_shape=jax.ShapeDtypeStruct((num_tiles, LANES), jnp.float32),
        grid_spec=pltpu.PrefetchScalarGridSpec(
            num_scalar_prefetch=0,
            grid=(num_tiles,),
            in_specs=[
                pl.BlockSpec((tr, LANES), lambda i: (i, 0)),   # logits tile
                pl.BlockSpec((tr, LANES), lambda i: (i, 0)),   # targets tile
                pw_spec,                                       # pos_weight rows
            ],
            out_specs=pl.BlockSpec((1, LANES), lambda i: (i, 0)),
        ),
        compiler_params=pltpu.CompilerParams(
            dimension_semantics=("parallel",),
        ),
        cost_estimate=cost,
    )(x2, y2, pw_arr)

    total_loss = jnp.sum(partials)
    if reduction == "mean":
        total_loss = total_loss / float(total)
    return total_loss


def focal_loss_ref(inputs, targets, pos_weight, gamma=2.0):
    # Pure-JAX reference mirroring the PyTorch module exactly.
    x = inputs.astype(jnp.float32)
    y = targets.astype(jnp.float32)
    pw = pos_weight.astype(jnp.float32)
    p = jax.nn.sigmoid(x)
    ce = pw * y * jnp.logaddexp(0.0, -x) + (1.0 - y) * jnp.logaddexp(0.0, x)
    p_t = p * y + (1.0 - p) * (1.0 - y)
    return jnp.mean(ce * (1.0 - p_t) ** gamma)


if __name__ == "__main__":
    # Small shapes consistent with the module: 6 toxicity labels, batch of 8.
    B, C = 8, 6
    key = jax.random.PRNGKey(0)
    k_x, k_y, k_w = jax.random.split(key, 3)

    logits = jax.random.normal(k_x, (B, C), dtype=jnp.float32) * 2.0
    targets = jax.random.bernoulli(k_y, p=0.3, shape=(B, C)).astype(jnp.float32)
    # Deterministic synthetic pos_weight (in PyTorch it comes from class-imbalance stats).
    pos_weight = jnp.abs(jax.random.normal(k_w, (C,), dtype=jnp.float32)) * 5.0 + 1.0

    out = jax.block_until_ready(jax.jit(focal_loss)(logits, targets, pos_weight))
    ref = focal_loss_ref(logits, targets, pos_weight)
    assert jnp.allclose(out, ref, rtol=1e-4, atol=1e-6), (out, ref)

    print("KERNEL_OK")
</pallas_src>

<mosaic_0001>
module attributes {stable_mosaic.version = 11 : i64} {
  func.func @kernel(%arg0: i32, %arg1: memref<1x128xf32, #tpu.memory_space<vmem>>, %arg2: memref<1x128xf32, #tpu.memory_space<vmem>>, %arg3: memref<1x128xf32, #tpu.memory_space<vmem>>, %arg4: memref<1x128xf32, #tpu.memory_space<vmem>>) attributes {dimension_semantics = [#tpu.dimension_semantics<parallel>], iteration_bounds = array<i64: 1>, scalar_prefetch = 0 : i64, scratch_operands = 0 : i64, tpu.core_type = #tpu.core_type<tc>, window_params = [{transform_indices = @transform_0, window_bounds = array<i64: 1, 128>}, {transform_indices = @transform_1, window_bounds = array<i64: 1, 128>}, {pipeline_mode = #tpu.pipeline_mode<synchronous>, transform_indices = @transform_2, window_bounds = array<i64: 1, 128>}, {transform_indices = @transform_3, window_bounds = array<i64: 1, 128>}]} {
    %c0 = arith.constant 0 : index
    %c0_0 = arith.constant 0 : index
    %0 = vector.load %arg1[%c0, %c0_0] : memref<1x128xf32, #tpu.memory_space<vmem>>, vector<1x128xf32>
    %c0_1 = arith.constant 0 : index
    %c0_2 = arith.constant 0 : index
    %1 = vector.load %arg2[%c0_1, %c0_2] : memref<1x128xf32, #tpu.memory_space<vmem>>, vector<1x128xf32>
    %c0_3 = arith.constant 0 : index
    %c0_4 = arith.constant 0 : index
    %2 = vector.load %arg3[%c0_3, %c0_4] : memref<1x128xf32, #tpu.memory_space<vmem>>, vector<1x128xf32>
    %3 = math.absf %0 : vector<1x128xf32>
    %cst = arith.constant 0.000000e+00 : f32
    %4 = vector.broadcast %cst : f32 to vector<1x128xf32>
    %5 = arith.subf %4, %3 : vector<1x128xf32>
    %6 = math.exp %5 : vector<1x128xf32>
    %cst_5 = arith.constant 0.000000e+00 : f32
    %7 = vector.broadcast %cst_5 : f32 to vector<1x128xf32>
    %8 = arith.subf %7, %0 : vector<1x128xf32>
    %cst_6 = arith.constant 0.000000e+00 : f32
    %9 = vector.broadcast %cst_6 : f32 to vector<1x128xf32>
    %10 = arith.maximumf %8, %9 : vector<1x128xf32>
    %11 = math.log1p %6 : vector<1x128xf32>
    %12 = arith.addf %10, %11 : vector<1x128xf32>
    %13 = arith.addf %12, %0 : vector<1x128xf32>
    %cst_7 = arith.constant 0.000000e+00 : f32
    %14 = vector.broadcast %cst_7 : f32 to vector<1x128xf32>
    %15 = arith.cmpf oge, %0, %14 : vector<1x128xf32>
    %cst_8 = arith.constant 1.000000e+00 : f32
    %16 = vector.broadcast %cst_8 : f32 to vector<1x128xf32>
    %17 = arith.select %15, %16, %6 : vector<1x128xi1>, vector<1x128xf32>
    %cst_9 = arith.constant 1.000000e+00 : f32
    %18 = vector.broadcast %cst_9 : f32 to vector<1x128xf32>
    %19 = arith.addf %18, %6 : vector<1x128xf32>
    %20 = arith.divf %17, %19 : vector<1x128xf32>
    %21 = arith.mulf %2, %1 : vector<1x128xf32>
    %22 = arith.mulf %21, %12 : vector<1x128xf32>
    %cst_10 = arith.constant 1.000000e+00 : f32
    %23 = vector.broadcast %cst_10 : f32 to vector<1x128xf32>
    %24 = arith.subf %23, %1 : vector<1x128xf32>
    %25 = arith.mulf %24, %13 : vector<1x128xf32>
    %26 = arith.addf %22, %25 : vector<1x128xf32>
    %27 = arith.mulf %20, %1 : vector<1x128xf32>
    %cst_11 = arith.constant 1.000000e+00 : f32
    %28 = vector.broadcast %cst_11 : f32 to vector<1x128xf32>
    %29 = arith.subf %28, %20 : vector<1x128xf32>
    %cst_12 = arith.constant 1.000000e+00 : f32
    %30 = vector.broadcast %cst_12 : f32 to vector<1x128xf32>
    %31 = arith.subf %30, %1 : vector<1x128xf32>
    %32 = arith.mulf %29, %31 : vector<1x128xf32>
    %33 = arith.addf %27, %32 : vector<1x128xf32>
    %cst_13 = arith.constant 1.000000e+00 : f32
    %34 = vector.broadcast %cst_13 : f32 to vector<1x128xf32>
    %35 = arith.subf %34, %33 : vector<1x128xf32>
    %36 = arith.mulf %35, %35 : vector<1x128xf32>
    %37 = arith.mulf %26, %36 : vector<1x128xf32>
    %c0_i32 = arith.constant 0 : i32
    %38 = arith.cmpi eq, %arg0, %c0_i32 : i32
    %39 = arith.extui %38 : i1 to i32
    %c0_i32_14 = arith.constant 0 : i32
    %40 = arith.cmpi ne, %39, %c0_i32_14 : i32
    scf.if %40 {
      %44 = tpu.iota {dimensions = array<i32: 0>} : vector<1x128xi32>
      %c128_i32 = arith.constant 128 : i32
      %45 = vector.broadcast %c128_i32 : i32 to vector<1x128xi32>
      %46 = arith.muli %44, %45 : vector<1x128xi32>
      %47 = tpu.iota {dimensions = array<i32: 1>} : vector<1x128xi32>
      %48 = arith.addi %46, %47 : vector<1x128xi32>
      %c48_i32 = arith.constant 48 : i32
      %49 = vector.broadcast %c48_i32 : i32 to vector<1x128xi32>
      %50 = arith.cmpi slt, %48, %49 : vector<1x128xi32>
      %cst_17 = arith.constant 0.000000e+00 : f32
      %51 = vector.broadcast %cst_17 : f32 to vector<1x128xf32>
      %52 = arith.select %50, %37, %51 : vector<1x128xi1>, vector<1x128xf32>
      %cst_18 = arith.constant dense<0.000000e+00> : vector<128xf32>
      %53 = vector.multi_reduction <add>, %52, %cst_18 [0] : vector<1x128xf32> to vector<128xf32>
      %54 = vector.shape_cast %53 : vector<128xf32> to vector<1x128xf32>
      %c0_19 = arith.constant 0 : index
      %c0_20 = arith.constant 0 : index
      %55 = vector.load %arg4[%c0_19, %c0_20] : memref<1x128xf32, #tpu.memory_space<vmem>>, vector<1x128xf32>
      tpu.vector_store %arg4[%c0_19, %c0_20], %54 {strides = array<i32>} : memref<1x128xf32, #tpu.memory_space<vmem>>, vector<1x128xf32>,
    } else {
    }
    %c0_i32_15 = arith.constant 0 : i32
    %41 = arith.cmpi slt, %arg0, %c0_i32_15 : i32
    %42 = arith.extui %41 : i1 to i32
    %c0_i32_16 = arith.constant 0 : i32
    %43 = arith.cmpi ne, %42, %c0_i32_16 : i32
    scf.if %43 {
      %cst_17 = arith.constant dense<0.000000e+00> : vector<128xf32>
      %44 = vector.multi_reduction <add>, %37, %cst_17 [0] : vector<1x128xf32> to vector<128xf32>
      %45 = vector.shape_cast %44 : vector<128xf32> to vector<1x128xf32>
      %c0_18 = arith.constant 0 : index
      %c0_19 = arith.constant 0 : index
      %46 = vector.load %arg4[%c0_18, %c0_19] : memref<1x128xf32, #tpu.memory_space<vmem>>, vector<1x128xf32>
      tpu.vector_store %arg4[%c0_18, %c0_19], %45 {strides = array<i32>} : memref<1x128xf32, #tpu.memory_space<vmem>>, vector<1x128xf32>,
    } else {
    }
    return
  }
  func.func @transform_0(%arg0: i32) -> (i32, i32) {
    %c0_i32 = arith.constant 0 : i32
    %c0_i32_0 = arith.constant 0 : i32
    return %arg0, %c0_i32 : i32, i32
  }
  func.func @transform_1(%arg0: i32) -> (i32, i32) {
    %c0_i32 = arith.constant 0 : i32
    %c0_i32_0 = arith.constant 0 : i32
    return %arg0, %c0_i32 : i32, i32
  }
  func.func @transform_2(%arg0: i32) -> (i32, i32) {
    %c0_i32 = arith.constant 0 : i32
    %c0_i32_0 = arith.constant 0 : i32
    %c0_i32_1 = arith.constant 0 : i32
    return %c0_i32, %c0_i32_0 : i32, i32
  }
  func.func @transform_3(%arg0: i32) -> (i32, i32) {
    %c0_i32 = arith.constant 0 : i32
    %c0_i32_0 = arith.constant 0 : i32
    return %arg0, %c0_i32 : i32, i32
  }
}

</mosaic_0001>

<bundles_post_ra>
// kernel: tile.8
= control target key start
LH: loop header
LB: loop body
LE: loop exit
PB: predicated region body
PF: predicated region fallthrough
CT: control target
= control target key end

     0   :  { %s34_s0 = inlined_call_operand.vmem [shape: f32[6], index: 0, kind: input, shape index: {}]   ;;  %s35_s1 = inlined_call_operand.vmem [shape: f32[22,6], index: 1, kind: output, shape index: {}]  }
   0x1   :  { %v4_v0 = vld [vmem:[%s34_s0] ss:$0 sm:$0xff] }
   0x2   :  { %5 = vst [vmem:[%s35_s1] sm:$0xff] %v4_v0 }
   0x3   :  { %10 = vst [vmem:[%s35_s1 + $0x8] sm:$0xff] %v4_v0 }
   0x4   :  { %11 = vst [vmem:[%s35_s1 + $0x10] sm:$0xff] %v4_v0 }

// kernel: tile.9
= control target key start
LH: loop header
LB: loop body
LE: loop exit
PB: predicated region body
PF: predicated region fallthrough
CT: control target
= control target key end

     0   :  { %vm9_vm0 = vcmask 15360   ;;  %s187_s12 = smov 126   ;;  %s188_s13 = smov 114   ;;  %vm3_vm1 = vcmask 48128   ;;  %vm13_vm2 = vcmask 31744   ;;  %vm16_vm3 = vcmask 1048560   ;;  %s290_s0 = inlined_call_operand.vmem [shape: f32[22,6], index: 0, kind: input, shape index: {}]   ;;  %s291_s1 = inlined_call_operand.vmem [shape: f32[132], index: 1, kind: output, shape index: {}]  }
   0x1   :  { %v144_v0 = vld [vmem:[%s290_s0 + $0x15] sm:$0x1]   ;;  %v147_v3 = vld [vmem:[%s290_s0 + $0x13] sm:$0x1]   ;;  %v149_v4 = vld [vmem:[%s290_s0 + $0x11] sm:$0x1]  }
   0x2   :  { %v145_v1 = vld [vmem:[%s290_s0 + $0x15] sm:$0x1]   ;;  %26 = vrot.lane.b32.xlu1 %v147_v3, %s188_s13  ;;  %s189_s16 = smov 102   ;;  %v146_v5 = vld [vmem:[%s290_s0 + $0x14] sm:$0x1]   ;;  %s190_s21 = smov 120  }
   0x3   :  { %v10_v2 = vsel %vm9_vm0, %v145_v1, %v144_v0  ;;  %38 = vrot.lane.b32.xlu2 %v149_v4, %s189_s16  ;;  %v148_v6 = vld [vmem:[%s290_s0 + $0x12] sm:$0x1]   ;;  %s191_s22 = smov 108   ;;  %v150_v7 = vld [vmem:[%s290_s0 + $0x10] sm:$0x1]   ;;  %s192_s25 = smov 96  }
   0x4   :  { %11 = vrot.lane.b32.xlu0 %v10_v2, %s187_s12  ;;  %v151_v8 = vld [vmem:[%s290_s0 + $0xf] sm:$0x1]   ;;  %v152_v9 = vld [vmem:[%s290_s0 + $0xe] sm:$0x1]   ;;  %s193_s30 = smov 90   ;;  %s194_s2 = smov 84  }
   0x5   :  { %v153_v10 = vld [vmem:[%s290_s0 + $0xd] sm:$0x1]   ;;  %s195_s5 = smov 78   ;;  %v154_v11 = vld [vmem:[%s290_s0 + $0xc] sm:$0x1]   ;;  %s196_s10 = smov 72  }
   0x6   :  { %v155_v12 = vld [vmem:[%s290_s0 + $0xb] sm:$0x1]   ;;  %s197_s11 = smov 66   ;;  %v156_v13 = vld [vmem:[%s290_s0 + $0xa] sm:$0x1]   ;;  %s198_s14 = smov 60  }
   0x7   :  { %v157_v14 = vld [vmem:[%s290_s0 + $0x9] sm:$0x1]   ;;  %v158_v15 = vld [vmem:[%s290_s0 + $0x8] sm:$0x1]   ;;  %s199_s19 = smov 54   ;;  %s200_s20 = smov 48  }
   0x8   :  { %v159_v16 = vld [vmem:[%s290_s0 + $0x7] sm:$0x1]   ;;  %s201_s23 = smov 42   ;;  %v160_v17 = vld [vmem:[%s290_s0 + $0x6] sm:$0x1]   ;;  %s202_s28 = smov 36  }
   0x9   :  { %v161_v18 = vld [vmem:[%s290_s0 + $0x5] sm:$0x1]   ;;  %s203_s29 = smov 30   ;;  %v162_v19 = vld [vmem:[%s290_s0 + $0x4] sm:$0x1]   ;;  %s204_s3 = smov 24  }
   0xa   :  { %32 = vrot.lane.b32.xlu1 %v148_v6, %s191_s22  ;;  %v163_v20 = vld [vmem:[%s290_s0 + $0x3] sm:$0x1]   ;;  %v164_v21 = vld [vmem:[%s290_s0 + $0x2] sm:$0x1]   ;;  %s205_s8 = smov 18   ;;  %s206_s9 = smov 12  }
   0xb   :  { %44 = vrot.lane.b32.xlu2 %v150_v7, %s192_s25  ;;  %v165_v22 = vld [vmem:[%s290_s0 + $0x1] sm:$0x1]   ;;  %s207_s12 = smov 6   ;;  %v2_v23 = vld [vmem:[%s290_s0] sm:$0x1]   ;;  %vm22_vm4 = vcmask 1032128  }
   0xc   :  { %20 = vrot.lane.b32.xlu0 %v146_v5, %s190_s21  ;;  %4 = vst.msk [vmem:[#allocation0] sm:$0x1] %vm3_vm1, %v2_v23   ;;  %vm28_vm5 = vcmask 982928   ;;  %vm34_vm6 = vcmask 933728   ;;  %vm40_vm7 = vcmask 884528   ;;  %vm46_vm8 = vcmask 835328  }
   0xd   :  { %vm52_vm9 = vcmask 786128   ;;  %vm58_vm10 = vcmask 736928   ;;  %vm64_vm11 = vcmask 687728   ;;  %vm70_vm12 = vcmask 638528  }
   0xe   :  { %vm76_vm13 = vcmask 589328   ;;  %vm82_vm14 = vcmask 540128   ;;  %vm88_vm15 = vcmask 490928   ;;  %vm94_vm0 = vcmask 441728  }
   0xf   :  { %vm100_vm1 = vcmask 392528  }
  0x12   :  { %56 = vrot.lane.b32.xlu1 %v152_v9, %s194_s2 }
  0x13   :  { %62 = vrot.lane.b32.xlu2 %v153_v10, %s195_s5 }
  0x14   :  { %50 = vrot.lane.b32.xlu0 %v151_v8, %s193_s30 }
  0x1a   :  { %74 = vrot.lane.b32.xlu1 %v155_v12, %s197_s11 }
  0x1b   :  { %80 = vrot.lane.b32.xlu2 %v156_v13, %s198_s14 }
  0x1c   :  { %68 = vrot.lane.b32.xlu0 %v154_v11, %s196_s10 }
  0x22   :  { %92 = vrot.lane.b32.xlu1 %v158_v15, %s200_s20 }
  0x23   :  { %98 = vrot.lane.b32.xlu2 %v159_v16, %s201_s23 }
  0x24   :  { %86 = vrot.lane.b32.xlu0 %v157_v14, %s199_s19 }
  0x2a   :  { %110 = vrot.lane.b32.xlu1 %v161_v18, %s203_s29 }
  0x2b   :  { %116 = vrot.lane.b32.xlu2 %v162_v19, %s204_s3 }
  0x2c   :  { %104 = vrot.lane.b32.xlu0 %v160_v17, %s202_s28 }
  0x32   :  { %128 = vrot.lane.b32.xlu1 %v164_v21, %s206_s9 }
  0x33   :  { %134 = vrot.lane.b32.xlu2 %v165_v22, %s207_s12 }
  0x34   :  { %122 = vrot.lane.b32.xlu0 %v163_v20, %s205_s8 }
  0x5d   :  { %v39_v24 = vpop.permute.xlu2 %38  }
  0x65   :  { %v45_v25 = vpop.permute.xlu2 %44  }
  0x6d   :  { %v63_v26 = vpop.permute.xlu2 %62  }
  0x74   :  { %v27_v28 = vpop.permute.xlu1 %26  }
  0x75   :  { %v81_v29 = vpop.permute.xlu2 %80  }
  0x76   :  { %v12_v27 = vpop.permute.xlu0 %11  }
  0x77   :  { %15 = vst.msk [vmem:[#allocation0 + $0x1] sm:$0x1] %vm13_vm2, %v12_v27   ;;  %vm106_vm2 = vcmask 343328  }
  0x78   :  { %17 = vst.msk [vmem:[#allocation0] sm:$0x1] %vm16_vm3, %v12_v27   ;;  %vm112_vm3 = vcmask 294128  }
  0x7c   :  { %v33_v31 = vpop.permute.xlu1 %32  }
  0x7d   :  { %v99_v32 = vpop.permute.xlu2 %98  }
  0x7e   :  { %v21_v30 = vpop.permute.xlu0 %20  }
  0x7f   :  { %23 = vst.msk [vmem:[#allocation0] sm:$0x1] %vm22_vm4, %v21_v30   ;;  %vm118_vm4 = vcmask 244928  }
  0x80   :  { %29 = vst.msk [vmem:[#allocation0] sm:$0x1] %vm28_vm5, %v27_v28   ;;  %vm124_vm5 = vcmask 195728  }
  0x81   :  { %35 = vst.msk [vmem:[#allocation0] sm:$0x1] %vm34_vm6, %v33_v31   ;;  %vm130_vm6 = vcmask 146528  }
  0x82   :  { %41 = vst.msk [vmem:[#allocation0] sm:$0x1] %vm40_vm7, %v39_v24   ;;  %vm136_vm7 = vcmask 97328  }
  0x83   :  { %47 = vst.msk [vmem:[#allocation0] sm:$0x1] %vm46_vm8, %v45_v25  }
  0x84   :  { %v57_v34 = vpop.permute.xlu1 %56  }
  0x85   :  { %v117_v35 = vpop.permute.xlu2 %116  }
  0x86   :  { %v51_v33 = vpop.permute.xlu0 %50  }
  0x87   :  { %53 = vst.msk [vmem:[#allocation0] sm:$0x1] %vm52_vm9, %v51_v33  }
  0x88   :  { %59 = vst.msk [vmem:[#allocation0] sm:$0x1] %vm58_vm10, %v57_v34  }
  0x89   :  { %65 = vst.msk [vmem:[#allocation0] sm:$0x1] %vm64_vm11, %v63_v26  }
  0x8c   :  { %v75_v37 = vpop.permute.xlu1 %74  }
  0x8d   :  { %v135_v38 = vpop.permute.xlu2 %134  }
  0x8e   :  { %v69_v36 = vpop.permute.xlu0 %68  }
  0x8f   :  { %71 = vst.msk [vmem:[#allocation0] sm:$0x1] %vm70_vm12, %v69_v36  }
  0x90   :  { %77 = vst.msk [vmem:[#allocation0] sm:$0x1] %vm76_vm13, %v75_v37  }
  0x91   :  { %83 = vst.msk [vmem:[#allocation0] sm:$0x1] %vm82_vm14, %v81_v29  }
  0x94   :  { %v93_v40 = vpop.permute.xlu1 %92  }
  0x96   :  { %v87_v39 = vpop.permute.xlu0 %86  }
  0x97   :  { %89 = vst.msk [vmem:[#allocation0] sm:$0x1] %vm88_vm15, %v87_v39  }
  0x98   :  { %95 = vst.msk [vmem:[#allocation0] sm:$0x1] %vm94_vm0, %v93_v40  }
  0x99   :  { %101 = vst.msk [vmem:[#allocation0] sm:$0x1] %vm100_vm1, %v99_v32  }
  0x9c   :  { %v111_v42 = vpop.permute.xlu1 %110  }
  0x9e   :  { %v105_v41 = vpop.permute.xlu0 %104  }
  0x9f   :  { %107 = vst.msk [vmem:[#allocation0] sm:$0x1] %vm106_vm2, %v105_v41  }
  0xa0   :  { %113 = vst.msk [vmem:[#allocation0] sm:$0x1] %vm112_vm3, %v111_v42  }
  0xa1   :  { %119 = vst.msk [vmem:[#allocation0] sm:$0x1] %vm118_vm4, %v117_v35  }
  0xa4   :  { %v129_v44 = vpop.permute.xlu1 %128  }
  0xa6   :  { %v123_v43 = vpop.permute.xlu0 %122  }
  0xa7   :  { %125 = vst.msk [vmem:[#allocation0] sm:$0x1] %vm124_vm5, %v123_v43  }
  0xa8   :  { %131 = vst.msk [vmem:[#allocation0] sm:$0x1] %vm130_vm6, %v129_v44  }
  0xa9   :  { %137 = vst.msk [vmem:[#allocation0] sm:$0x1] %vm136_vm7, %v135_v38  }
  0xb0   :  { %v140_v45 = vld [vmem:[#allocation0] sm:$0x3] }
  0xb1   :  { %143 = vst [vmem:[%s291_s1] sm:$0x3] %v140_v45 }

// kernel: focal_loss.1
= control target key start
LH: loop header
LB: loop body
LE: loop exit
PB: predicated region body
PF: predicated region fallthrough
CT: control target
= control target key end

     0   :  { %v68_v23 = vlaneseq  ;;  %s132_s0 = inlined_call_operand.vmem [shape: f32[1,128], index: 0, kind: input, shape index: {}]   ;;  %s133_s1 = inlined_call_operand.vmem [shape: f32[1,128], index: 1, kind: input, shape index: {}]   ;;  %s134_s2 = inlined_call_operand.vmem [shape: f32[1,128], index: 2, kind: input, shape index: {}]   ;;  %s135_s3 = inlined_call_operand.vmem [shape: f32[1,128], index: 3, kind: output, shape index: {}]  }
   0x1   :  { %v14_v0 = vld [vmem:[%s132_s0] sm:$0x1] }
   0x2   :  { %v17_v1 = vand.u32 2147483647, %v14_v0  ;;  %v21_v9 = vsub.f32 0.0, %v14_v0  ;;  %vm34_vm3 = vcmp.ge.f32.partialorder %v14_v0, 0.0  ;;  %v15_v26 = vld [vmem:[%s133_s1] sm:$0x1] }
   0x3   :  { %v16_v27 = vld [vmem:[%s134_s2] sm:$0x1]  ;;  %v69_v31 = vshrl.u32 %v68_v23, 7  ;;  %v54_v35 = vsub.f32 1.0, %v15_v26  ;;  %v72_v39 = vand.u32 127, %v68_v23 }
   0x4   :  { %v18_v2 = vsub.f32 0.0, %v17_v1  ;;  %v22_v16 = vmax.f32 %v21_v9, 0.0  ;;  %v52_v34 = vmul.f32 %v16_v27, %v15_v26 }
   0x5   :  { %v70_v38 = vmul.u32 128, %v69_v31 }
   0x6   :  { %v19_v3 = vmul.f32 1.442695, %v18_v2 }
   0x7   :  { %v73_v44 = vadd.s32 %v72_v39, %v70_v38 }
   0x8   :  { %88 = vpow2.f32 %v19_v3 }
   0x9   :  { %vm74_vm6 = vcmp.lt.s32.totalorder %v73_v44, 48 }
   0xe   :  { %v89_v4 = vpop.eup %88 }
   0xf   :  { %v23_v5 = vadd.f32 1.0, %v89_v4  ;;  %v26_v6 = vmul.f32 -0.5, %v89_v4  ;;  %v29_v8 = vand.u32 2147483647, %v89_v4  ;;  %v35_v28 = vsel %vm34_vm3, 1.0, %v89_v4 }
  0x11   :  { %90 = vlog2.f32 %v23_v5  ;;  %v27_v7 = vadd.f32 1.0, %v26_v6  ;;  %vm117_vm0 = vcmp.lt.f32.partialorder %v29_v8, 0.0004427343  ;;  %v48_v17 = vand.u32 2147483648, %v23_v5 }
  0x12   :  { %92 = vrcp.f32 %v23_v5  ;;  %vm42_vm1 = vweird.f32 %v23_v5  ;;  %v46_v19 = vand.u32 2147483647, %v23_v5 }
  0x13   :  { %v28_v13 = vmul.f32 %v89_v4, %v27_v7  ;;  %v49_v22 = vor.u32 1.1754944e-38, %v48_v17 }
  0x14   :  { %vm47_vm5 = vcmp.eq.f32.partialorder %v46_v19, 8.507059e+37 }
  0x17   :  { %v91_v10 = vpop.eup %90 }
  0x18   :  { %v93_v11 = vpop.eup %92  ;;  %v25_v12 = vmul.f32 0.6931472, %v91_v10 }
  0x19   :  { %v38_v15 = vmul.f32 %v93_v11, %v23_v5  ;;  %vm43_vm2 = vweird.f32 %v93_v11 }
  0x1a   :  { %v31_v20 = vsel %vm117_vm0, %v28_v13, %v25_v12  ;;  %vm44_vm4 = vmor %vm42_vm1, %vm43_vm2 }
  0x1b   :  { %v39_v18 = vsub.f32 1.0, %v38_v15  ;;  %v32_v24 = vadd.f32 %v31_v20, %v22_v16 }
  0x1d   :  { %v40_v21 = vmul.f32 %v93_v11, %v39_v18  ;;  %v33_v32 = vadd.f32 %v32_v24, %v14_v0  ;;  %v53_v40 = vmul.f32 %v52_v34, %v32_v24 }
  0x1f   :  { %v41_v25 = vadd.f32 %v93_v11, %v40_v21  ;;  %v55_v41 = vmul.f32 %v54_v35, %v33_v32 }
  0x21   :  { %v45_v29 = vsel %vm44_vm4, %v93_v11, %v41_v25  ;;  %v56_v45 = vadd.f32 %v55_v41, %v53_v40 }
  0x22   :  { %v50_v30 = vsel %vm47_vm5, %v49_v22, %v45_v29 }
  0x23   :  { %v51_v33 = vmul.f32 %v50_v30, %v35_v28 }
  0x25   :  { %v57_v36 = vmul.f32 %v51_v33, %v15_v26  ;;  %v58_v37 = vsub.f32 1.0, %v51_v33 }
  0x27   :  { %v59_v42 = vmul.f32 %v58_v37, %v54_v35 }
  0x29   :  { %v60_v43 = vadd.f32 %v59_v42, %v57_v36 }
  0x2b   :  { %v61_v46 = vsub.f32 1.0, %v60_v43 }
  0x2d   :  { %v62_v47 = vmul.f32 %v61_v46, %v61_v46 }
  0x2f   :  { %v63_v48 = vmul.f32 %v62_v47, %v56_v45 }
  0x31   :  { %v75_v49 = vsel %vm74_vm6, %v63_v48, 0.0 }
  0x32   :  { %77 = vst [vmem:[%s135_s3] sm:$0x1] %v75_v49 }

</bundles_post_ra>
